<compile_context>
chip_gen: v7x
topology: tpu7x:2x2x1
jax: 0.10.0
libtpu: 0.0.40
codegen_flags: <defaults>
</compile_context>

<pallas_src>
import jax
import jax.numpy as jnp
from jax import lax
from jax.experimental import pallas as pl
from jax.experimental.pallas import tpu as pltpu


def backbone_update_kernel(x_ref, w_ref, b_ref, out_ref):
    # Fused projection contracted over D — residues land on the lane axis:
    #   y = W_fused @ x^T -> [8, tn] f32  (rows: b, c, d, tx, ty, tz, pad, pad)
    # Operands stay in the caller's dtype (bf16 in -> bf16 MXU pass, f32 acc).
    y = lax.dot_general(
        w_ref[...], x_ref[...],
        dimension_numbers=(((1,), (1,)), ((), ())),
        preferred_element_type=jnp.float32,
    ) + b_ref[...]                                   # [8, 1] f32, lane-broadcast

    bq = y[0:1, :]
    cq = y[1:2, :]
    dq = y[2:3, :]
    tx = y[3:4, :]
    ty = y[4:5, :]
    tz = y[5:6, :]

    # 1 / sqrt(1 + b^2 + c^2 + d^2) — single EUP rsqrt on a lane-dense [1, tn] row.
    inv = lax.rsqrt(1.0 + bq * bq + cq * cq + dq * dq)

    a = inv
    b = bq * inv
    c = cq * inv
    d = dq * inv

    aa, bb, cc, dd = a * a, b * b, c * c, d * d
    ab, ac, ad = a * b, a * c, a * d
    bc, bd, cd = b * c, b * d, c * d

    r00 = aa + bb - cc - dd
    r01 = 2.0 * (bc - ad)
    r02 = 2.0 * (bd + ac)
    r10 = 2.0 * (bc + ad)
    r11 = aa - bb + cc - dd
    r12 = 2.0 * (cd - ab)
    r20 = 2.0 * (bd - ac)
    r21 = 2.0 * (cd + ab)
    r22 = aa - bb - cc + dd

    # One lane-dense [16, tn] slab (12 real rows + 4 zero pad rows) -> a single
    # wide, sublane-aligned, unmasked store.
    pad = jnp.zeros((4, y.shape[1]), jnp.float32)
    out = jnp.concatenate(
        [r00, r01, r02, r10, r11, r12, r20, r21, r22, tx, ty, tz, pad], axis=0)
    out_ref[...] = out.astype(out_ref.dtype)


def _choose_tile(n, d, itemsize, *, budget_bytes=12 << 20, max_tn=4096, min_steps=4):
    """Pick a multiple-of-128 residue tile so that:
      (a) double-buffered input + double-buffered output fit the VMEM budget,
      (b) the 1-D grid keeps >= min_steps steps when N is large enough
          (pipelining + megacore sharding across v7x's 2 TensorCores),
      (c) ragged-N padding is minimized (ties -> larger tile)."""
    n128 = max(128, pl.cdiv(n, 128) * 128)
    per_row = 2 * d * itemsize + 2 * 16 * 4          # dbl-buffered in + out
    cap = min(max_tn, n128, max(128, (budget_bytes // per_row) // 128 * 128))
    if n128 // cap < min_steps and n128 >= min_steps * 128:
        cap = max(128, (n128 // min_steps) // 128 * 128)
    best_tn, best_pad = 128, pl.cdiv(n, 128) * 128 - n
    for tn in range(128, cap + 1, 128):
        padding = pl.cdiv(n, tn) * tn - n
        if padding < best_pad or (padding == best_pad and tn > best_tn):
            best_tn, best_pad = tn, padding
    return best_tn


def backbone_update(single_rep, wq, bq, wt, bt, *, tile_n=None):
    """single_rep: [N, D] (f32 or bf16).  wq/wt: torch-style [3, D].  bq/bt: [3].

    Returns (Rs [N,3,3] f32, ts [N,3] f32, bb_mask [N] f32)."""
    N, D = single_rep.shape
    dt = single_rep.dtype
    itemsize = jnp.dtype(dt).itemsize

    tn = _choose_tile(N, D, itemsize) if tile_n is None else int(tile_n)
    assert tn % 128 == 0, "tile_n must be a multiple of 128"
    n_pad = pl.cdiv(N, tn) * tn
    x = single_rep if n_pad == N else jnp.pad(single_rep, ((0, n_pad - N), (0, 0)))

    # Fuse the two Linear layers: rows 0-2 quaternion (b,c,d), rows 3-5 ts,
    # rows 6-7 zero pad.  Weights follow the activation dtype; bias is added
    # post-matmul in f32.
    w_fused = (jnp.zeros((8, D), dt)
               .at[0:3].set(wq.astype(dt))
               .at[3:6].set(wt.astype(dt)))
    b_fused = (jnp.zeros((8, 1), jnp.float32)
               .at[0:3, 0].set(bq.astype(jnp.float32))
               .at[3:6, 0].set(bt.astype(jnp.float32)))

    cost = pl.CostEstimate(
        flops=2 * n_pad * D * 8 + 40 * n_pad,
        transcendentals=n_pad,
        bytes_accessed=n_pad * D * itemsize + 16 * n_pad * 4
        + 8 * D * itemsize + 8 * 4,
    )

    out = pl.pallas_call(
        backbone_update_kernel,
        out_shape=jax.ShapeDtypeStruct((16, n_pad), jnp.float32),
        grid=(n_pad // tn,),
        in_specs=[
            pl.BlockSpec((tn, D), lambda i: (i, 0)),   # activation tile
            pl.BlockSpec((8, D), lambda i: (0, 0)),    # fused weights (resident)
            pl.BlockSpec((8, 1), lambda i: (0, 0)),    # fused bias (resident)
        ],
        out_specs=pl.BlockSpec((16, tn), lambda i: (0, i)),
        compiler_params=pltpu.CompilerParams(
            dimension_semantics=("parallel",),
            vmem_limit_bytes=32 * 1024 * 1024),
        cost_estimate=cost,
    )(x, w_fused, b_fused)

    # Cheap layout glue on the small [16, n_pad] slab; keep it inside the
    # caller's jit so XLA fuses the transpose/reshape with downstream ops.
    out_t = out[:12, :N].T                             # [N, 12]
    Rs = out_t[:, :9].reshape(N, 3, 3)
    ts = out_t[:, 9:12]
    bb_mask = jnp.ones((N,), dtype=jnp.float32)        # constant, glue
    return Rs, ts, bb_mask


def _reference(single_rep, wq, bq, wt, bt):
    """Plain-JAX replica of the PyTorch forward for verification (f32)."""
    bcd = single_rep @ wq.T + bq                          # [N, 3]
    ts = single_rep @ wt.T + bt
    norm = jnp.sqrt(1.0 + jnp.sum(bcd ** 2, axis=-1))     # [N]
    a = 1.0 / norm
    b, c, d = (bcd / norm[:, None]).T
    rows = [
        [a**2 + b**2 - c**2 - d**2, 2 * (b * c - a * d), 2 * (b * d + a * c)],
        [2 * (b * c + a * d), a**2 - b**2 + c**2 - d**2, 2 * (c * d - a * b)],
        [2 * (b * d - a * c), 2 * (c * d + a * b), a**2 - b**2 - c**2 + d**2],
    ]
    Rs = jnp.concatenate(
        [jnp.stack(r, axis=1)[:, None, :] for r in rows], axis=1)
    return Rs, ts, jnp.ones((single_rep.shape[0],), jnp.float32)


def _make_inputs(key, n, d):
    k_x, k_wq, k_bq, k_wt, k_bt = jax.random.split(key, 5)
    single_rep = jax.random.normal(k_x, (n, d), jnp.float32)
    wq = jax.random.normal(k_wq, (3, d), jnp.float32) * 0.1
    bq = jax.random.normal(k_bq, (3,), jnp.float32) * 0.1
    wt = jax.random.normal(k_wt, (3, d), jnp.float32) * 0.1
    bt = jax.random.normal(k_bt, (3,), jnp.float32) * 0.1
    return single_rep, wq, bq, wt, bt


if __name__ == "__main__":
    key = jax.random.PRNGKey(0)
    k1, k2, k3 = jax.random.split(key, 3)

    # --- Test 1: tiny module-consistent shapes (ragged N -> padded, 1 step) ---
    N_RES, SINGLE_DIM = 8, 32
    x, wq, bq, wt, bt = _make_inputs(k1, N_RES, SINGLE_DIM)
    Rs, ts, bb_mask = jax.jit(backbone_update)(x, wq, bq, wt, bt)
    jax.block_until_ready((Rs, ts, bb_mask))

    Rs_ref, ts_ref, mask_ref = _reference(x, wq, bq, wt, bt)
    assert Rs.shape == (N_RES, 3, 3) and ts.shape == (N_RES, 3) and bb_mask.shape == (N_RES,)
    assert jnp.allclose(Rs, Rs_ref, atol=1e-5, rtol=1e-5)
    assert jnp.allclose(ts, ts_ref, atol=1e-5, rtol=1e-5)
    assert jnp.allclose(bb_mask, mask_ref)

    # --- Test 2: explicit tiled / pipelined path (grid of 3 steps, tn=128) ---
    N2, D2 = 384, 128
    x2, wq2, bq2, wt2, bt2 = _make_inputs(k2, N2, D2)
    jitted2 = jax.jit(backbone_update, static_argnames=("tile_n",))
    Rs2, ts2, bb2 = jitted2(x2, wq2, bq2, wt2, bt2, tile_n=128)
    jax.block_until_ready((Rs2, ts2, bb2))

    Rs2_ref, ts2_ref, mask2_ref = _reference(x2, wq2, bq2, wt2, bt2)
    assert jnp.allclose(Rs2, Rs2_ref, atol=1e-4, rtol=1e-4)
    assert jnp.allclose(ts2, ts2_ref, atol=1e-4, rtol=1e-4)
    assert jnp.allclose(bb2, mask2_ref)

    # --- Test 3: bf16 activations, auto tile (tn=256, 4 steps), f32 accumulate ---
    N3, D3 = 1024, 256
    x3, wq3, bq3, wt3, bt3 = _make_inputs(k3, N3, D3)
    x3_bf = x3.astype(jnp.bfloat16)
    Rs3, ts3, bb3 = jax.jit(backbone_update)(x3_bf, wq3, bq3, wt3, bt3)
    jax.block_until_ready((Rs3, ts3, bb3))

    # Reference on the same bf16-rounded operands (kernel accumulates in f32).
    Rs3_ref, ts3_ref, mask3_ref = _reference(
        x3_bf.astype(jnp.float32),
        wq3.astype(jnp.bfloat16).astype(jnp.float32), bq3,
        wt3.astype(jnp.bfloat16).astype(jnp.float32), bt3)
    assert jnp.allclose(Rs3, Rs3_ref, atol=1e-3, rtol=1e-3)
    assert jnp.allclose(ts3, ts3_ref, atol=1e-3, rtol=1e-3)
    assert jnp.allclose(bb3, mask3_ref)

    print("KERNEL_OK")
</pallas_src>

<mosaic_0001>
module attributes {stable_mosaic.version = 11 : i64} {
  func.func @backbone_update_kernel(%arg0: i32, %arg1: memref<128x32xf32, #tpu.memory_space<vmem>>, %arg2: memref<8x32xf32, #tpu.memory_space<vmem>>, %arg3: memref<8x1xf32, #tpu.memory_space<vmem>>, %arg4: memref<16x128xf32, #tpu.memory_space<vmem>>) attributes {dimension_semantics = [#tpu.dimension_semantics<parallel>], iteration_bounds = array<i64: 1>, scalar_prefetch = 0 : i64, scratch_operands = 0 : i64, tpu.core_type = #tpu.core_type<tc>, window_params = [{transform_indices = @transform_0, window_bounds = array<i64: 128, 32>}, {pipeline_mode = #tpu.pipeline_mode<synchronous>, transform_indices = @transform_1, window_bounds = array<i64: 8, 32>}, {pipeline_mode = #tpu.pipeline_mode<synchronous>, transform_indices = @transform_2, window_bounds = array<i64: 8, 1>}, {transform_indices = @transform_3, window_bounds = array<i64: 16, 128>}]} {
    %c0 = arith.constant 0 : index
    %c0_0 = arith.constant 0 : index
    %0 = vector.load %arg2[%c0, %c0_0] : memref<8x32xf32, #tpu.memory_space<vmem>>, vector<8x32xf32>
    %c0_1 = arith.constant 0 : index
    %c0_2 = arith.constant 0 : index
    %1 = vector.load %arg1[%c0_1, %c0_2] : memref<128x32xf32, #tpu.memory_space<vmem>>, vector<128x32xf32>
    %cst = arith.constant dense<0.000000e+00> : vector<8x128xf32>
    %2 = tpu.matmul %0, %1, %cst {dimension_numbers = #tpu.dot_dimension_numbers<[1], [1], [0], [0], [0, 0, 1, 0], [], []>} : vector<8x32xf32>, vector<128x32xf32>, vector<8x128xf32> -> vector<8x128xf32>
    %c0_3 = arith.constant 0 : index
    %c0_4 = arith.constant 0 : index
    %3 = vector.load %arg3[%c0_3, %c0_4] : memref<8x1xf32, #tpu.memory_space<vmem>>, vector<8x1xf32>
    %4 = vector.broadcast %3 : vector<8x1xf32> to vector<8x128xf32>
    %5 = arith.addf %2, %4 : vector<8x128xf32>
    %6 = vector.extract_strided_slice %5 {offsets = [0, 0], sizes = [1, 128], strides = [1, 1]} : vector<8x128xf32> to vector<1x128xf32>
    %7 = vector.extract_strided_slice %5 {offsets = [1, 0], sizes = [1, 128], strides = [1, 1]} : vector<8x128xf32> to vector<1x128xf32>
    %8 = vector.extract_strided_slice %5 {offsets = [2, 0], sizes = [1, 128], strides = [1, 1]} : vector<8x128xf32> to vector<1x128xf32>
    %9 = vector.extract_strided_slice %5 {offsets = [3, 0], sizes = [1, 128], strides = [1, 1]} : vector<8x128xf32> to vector<1x128xf32>
    %10 = vector.extract_strided_slice %5 {offsets = [4, 0], sizes = [1, 128], strides = [1, 1]} : vector<8x128xf32> to vector<1x128xf32>
    %11 = vector.extract_strided_slice %5 {offsets = [5, 0], sizes = [1, 128], strides = [1, 1]} : vector<8x128xf32> to vector<1x128xf32>
    %12 = arith.mulf %6, %6 : vector<1x128xf32>
    %cst_5 = arith.constant 1.000000e+00 : f32
    %13 = vector.broadcast %cst_5 : f32 to vector<1x128xf32>
    %14 = arith.addf %13, %12 : vector<1x128xf32>
    %15 = arith.mulf %7, %7 : vector<1x128xf32>
    %16 = arith.addf %14, %15 : vector<1x128xf32>
    %17 = arith.mulf %8, %8 : vector<1x128xf32>
    %18 = arith.addf %16, %17 : vector<1x128xf32>
    %19 = math.rsqrt %18 : vector<1x128xf32>
    %20 = arith.mulf %6, %19 : vector<1x128xf32>
    %21 = arith.mulf %7, %19 : vector<1x128xf32>
    %22 = arith.mulf %8, %19 : vector<1x128xf32>
    %23 = arith.mulf %19, %19 : vector<1x128xf32>
    %24 = arith.mulf %20, %20 : vector<1x128xf32>
    %25 = arith.mulf %21, %21 : vector<1x128xf32>
    %26 = arith.mulf %22, %22 : vector<1x128xf32>
    %27 = arith.mulf %19, %20 : vector<1x128xf32>
    %28 = arith.mulf %19, %21 : vector<1x128xf32>
    %29 = arith.mulf %19, %22 : vector<1x128xf32>
    %30 = arith.mulf %20, %21 : vector<1x128xf32>
    %31 = arith.mulf %20, %22 : vector<1x128xf32>
    %32 = arith.mulf %21, %22 : vector<1x128xf32>
    %33 = arith.addf %23, %24 : vector<1x128xf32>
    %34 = arith.subf %33, %25 : vector<1x128xf32>
    %35 = arith.subf %34, %26 : vector<1x128xf32>
    %36 = arith.subf %30, %29 : vector<1x128xf32>
    %cst_6 = arith.constant 2.000000e+00 : f32
    %37 = vector.broadcast %cst_6 : f32 to vector<1x128xf32>
    %38 = arith.mulf %37, %36 : vector<1x128xf32>
    %39 = arith.addf %31, %28 : vector<1x128xf32>
    %cst_7 = arith.constant 2.000000e+00 : f32
    %40 = vector.broadcast %cst_7 : f32 to vector<1x128xf32>
    %41 = arith.mulf %40, %39 : vector<1x128xf32>
    %42 = arith.addf %30, %29 : vector<1x128xf32>
    %cst_8 = arith.constant 2.000000e+00 : f32
    %43 = vector.broadcast %cst_8 : f32 to vector<1x128xf32>
    %44 = arith.mulf %43, %42 : vector<1x128xf32>
    %45 = arith.subf %23, %24 : vector<1x128xf32>
    %46 = arith.addf %45, %25 : vector<1x128xf32>
    %47 = arith.subf %46, %26 : vector<1x128xf32>
    %48 = arith.subf %32, %27 : vector<1x128xf32>
    %cst_9 = arith.constant 2.000000e+00 : f32
    %49 = vector.broadcast %cst_9 : f32 to vector<1x128xf32>
    %50 = arith.mulf %49, %48 : vector<1x128xf32>
    %51 = arith.subf %31, %28 : vector<1x128xf32>
    %cst_10 = arith.constant 2.000000e+00 : f32
    %52 = vector.broadcast %cst_10 : f32 to vector<1x128xf32>
    %53 = arith.mulf %52, %51 : vector<1x128xf32>
    %54 = arith.addf %32, %27 : vector<1x128xf32>
    %cst_11 = arith.constant 2.000000e+00 : f32
    %55 = vector.broadcast %cst_11 : f32 to vector<1x128xf32>
    %56 = arith.mulf %55, %54 : vector<1x128xf32>
    %57 = arith.subf %23, %24 : vector<1x128xf32>
    %58 = arith.subf %57, %25 : vector<1x128xf32>
    %59 = arith.addf %58, %26 : vector<1x128xf32>
    %cst_12 = arith.constant 0.000000e+00 : f32
    %60 = vector.broadcast %cst_12 : f32 to vector<4x128xf32>
    %61 = tpu.concatenate %35, %38, %41, %44, %47, %50, %53, %56, %59, %9, %10, %11, %60 in 0 : vector<1x128xf32>, vector<1x128xf32>, vector<1x128xf32>, vector<1x128xf32>, vector<1x128xf32>, vector<1x128xf32>, vector<1x128xf32>, vector<1x128xf32>, vector<1x128xf32>, vector<1x128xf32>, vector<1x128xf32>, vector<1x128xf32>, vector<4x128xf32> -> vector<16x128xf32>
    %c0_13 = arith.constant 0 : index
    %c0_14 = arith.constant 0 : index
    %62 = vector.load %arg4[%c0_13, %c0_14] : memref<16x128xf32, #tpu.memory_space<vmem>>, vector<16x128xf32>
    tpu.vector_store %arg4[%c0_13, %c0_14], %61 {strides = array<i32>} : memref<16x128xf32, #tpu.memory_space<vmem>>, vector<16x128xf32>,
    return
  }
  func.func @transform_0(%arg0: i32) -> (i32, i32) {
    %c0_i32 = arith.constant 0 : i32
    %c0_i32_0 = arith.constant 0 : i32
    return %arg0, %c0_i32 : i32, i32
  }
  func.func @transform_1(%arg0: i32) -> (i32, i32) {
    %c0_i32 = arith.constant 0 : i32
    %c0_i32_0 = arith.constant 0 : i32
    %c0_i32_1 = arith.constant 0 : i32
    return %c0_i32, %c0_i32_0 : i32, i32
  }
  func.func @transform_2(%arg0: i32) -> (i32, i32) {
    %c0_i32 = arith.constant 0 : i32
    %c0_i32_0 = arith.constant 0 : i32
    %c0_i32_1 = arith.constant 0 : i32
    return %c0_i32, %c0_i32_0 : i32, i32
  }
  func.func @transform_3(%arg0: i32) -> (i32, i32) {
    %c0_i32 = arith.constant 0 : i32
    %c0_i32_0 = arith.constant 0 : i32
    return %c0_i32, %arg0 : i32, i32
  }
}

</mosaic_0001>

<bundles_post_ra>
// kernel: backbone_update.1
= control target key start
LH: loop header
LB: loop body
LE: loop exit
PB: predicated region body
PF: predicated region fallthrough
CT: control target
= control target key end

     0   :  { %vm37_vm0 = vcmask 261120   ;;  %v380_v0 = vmov 0.0|0.0   ;;  %vm381_vm2 = vmmov 0   ;;  %v382_v4 = vmov 0.0   ;;  %s493_s0 = inlined_call_operand.vmem [shape: f32[128,32], index: 0, kind: input, shape index: {}]   ;;  %s494_s2 = inlined_call_operand.vmem [shape: f32[8,1], index: 2, kind: input, shape index: {}]   ;;  %s495_s1 = inlined_call_operand.vmem [shape: f32[8,32], index: 1, kind: input, shape index: {}]   ;;  %s496_s3 = inlined_call_operand.vmem [shape: f32[16,128], index: 3, kind: output, shape index: {}]  }
   0x1   :  { %341 = vmatprep.subr.bf16.mxu0 %v380_v0  ;;  %v15_v1 = vld [vmem:[%s493_s0] sm:$0xff]  ;;  %v16_v2 = vld [vmem:[%s493_s0 + $0x8] sm:$0xff]  ;;  %vm412_vm1 = vmpackc.low %vm37_vm0, %vm37_vm0  ;;  %338 = vmatprep.mubr.msk.f32.mxu0 %vm381_vm2, %v382_v4  ;;  %v383_v6 = vmov 0   ;;  %vm248_vm3 = vcmask 1040384   ;;  %vm250_vm4 = vcmask 1041408   ;;  %vm252_vm5 = vcmask 1042432  }
   0x2   :  { %v342_v5 = vpack.c.bf16 %v16_v2, %v15_v1  ;;  %377 = vset.pattern.permute.xlu0 %v383_v6  ;;  %v17_v7 = vld [vmem:[%s493_s0 + $0x10] sm:$0xff]  ;;  %v18_v8 = vld [vmem:[%s493_s0 + $0x18] sm:$0xff]  ;;  %v31_v9 = vld [vmem:[%s494_s2] sm:$0xff]  ;;  %vm254_vm6 = vcmask 1043456   ;;  %vm256_vm7 = vcmask 1044480   ;;  %vm258_vm8 = vcmask 1045504  }
   0x3   :  { %v346_v10 = vpack.c.bf16 %v18_v8, %v17_v7  ;;  %34 = vperm.xlu0 %377, %v31_v9   ;;  %v19_v11 = vld [vmem:[%s493_s0 + $0x20] sm:$0xff]  ;;  %v20_v12 = vld [vmem:[%s493_s0 + $0x28] sm:$0xff]  ;;  %v21_v14 = vld [vmem:[%s493_s0 + $0x30] sm:$0xff]  ;;  %vm260_vm9 = vcmask 1046528  }
   0x4   :  { %344 = vmatpush3.bf16.xpose.msk.msra.mxu0 %vm412_vm1, %v342_v5  ;;  %v350_v13 = vpack.c.bf16 %v20_v12, %v19_v11  ;;  %v22_v15 = vld [vmem:[%s493_s0 + $0x38] sm:$0xff]  ;;  %v23_v17 = vld [vmem:[%s493_s0 + $0x40] sm:$0xff]  ;;  %v24_v18 = vld [vmem:[%s493_s0 + $0x48] sm:$0xff] }
   0x5   :  { %345 = vmatprep.subr.bf16.mxu0 %v380_v0  ;;  %v354_v16 = vpack.c.bf16 %v22_v15, %v21_v14  ;;  %v358_v19 = vpack.c.bf16 %v24_v18, %v23_v17  ;;  %v25_v20 = vld [vmem:[%s493_s0 + $0x50] sm:$0xff]  ;;  %v26_v21 = vld [vmem:[%s493_s0 + $0x58] sm:$0xff]  ;;  %v27_v23 = vld [vmem:[%s493_s0 + $0x60] sm:$0xff] }
   0x6   :  { %v362_v22 = vpack.c.bf16 %v26_v21, %v25_v20  ;;  %v28_v24 = vld [vmem:[%s493_s0 + $0x68] sm:$0xff]  ;;  %v29_v26 = vld [vmem:[%s493_s0 + $0x70] sm:$0xff]  ;;  %v30_v27 = vld [vmem:[%s493_s0 + $0x78] sm:$0xff] }
   0x7   :  { %v366_v25 = vpack.c.bf16 %v28_v24, %v27_v23  ;;  %v370_v28 = vpack.c.bf16 %v30_v27, %v29_v26  ;;  %v14_v29 = vld [vmem:[%s495_s1] sm:$0xff] }
   0xc   :  { %348 = vmatpush3.bf16.xpose.msk.msra.mxu0 %vm412_vm1, %v346_v10 }
   0xd   :  { %349 = vmatprep.subr.bf16.mxu0 %v380_v0 }
  0x14   :  { %352 = vmatpush3.bf16.xpose.msk.msra.mxu0 %vm412_vm1, %v350_v13 }
  0x15   :  { %353 = vmatprep.subr.bf16.mxu0 %v380_v0 }
  0x1c   :  { %356 = vmatpush3.bf16.xpose.msk.msra.mxu0 %vm412_vm1, %v354_v16 }
  0x1d   :  { %357 = vmatprep.subr.bf16.mxu0 %v380_v0 }
  0x24   :  { %360 = vmatpush3.bf16.xpose.msk.msra.mxu0 %vm412_vm1, %v358_v19 }
  0x25   :  { %361 = vmatprep.subr.bf16.mxu0 %v380_v0 }
  0x2c   :  { %364 = vmatpush3.bf16.xpose.msk.msra.mxu0 %vm412_vm1, %v362_v22 }
  0x2d   :  { %365 = vmatprep.subr.bf16.mxu0 %v380_v0 }
  0x34   :  { %368 = vmatpush3.bf16.xpose.msk.msra.mxu0 %vm412_vm1, %v366_v25 }
  0x35   :  { %369 = vmatprep.subr.bf16.mxu0 %v380_v0 }
  0x3c   :  { %372 = vmatpush3.bf16.xpose.msk.msra.mxu0 %vm412_vm1, %v370_v28 }
  0x43   :  { %339 = vmatmul.mubr.msk.f32.vlgmr.msra.gmra.mrb[0].mxu0 %vm37_vm0, %v14_v29 }
  0x82   :  { %v35_v30 = vpop.permute.xlu0 %34 }
 0x116   :  { %v155_v31 = vpop.f32.mrb[0].mxu0 }
 0x117   :  { %v156_v32 = vadd.f32 %v155_v31, %v35_v30  ;;  %v340_v33 = vpop.f32.mrb[1].mxu0 }
 0x119   :  { %v159_v34 = vmul.f32 %v156_v32, %v156_v32  ;;  %v246_v18 = vrot.slane %v156_v32, 2 }
 0x11b   :  { %v160_v35 = vadd.f32 1.0, %v159_v34  ;;  %v162_v36 = vrot.slane %v159_v34, 1  ;;  %v165_v38 = vrot.slane %v159_v34, 2 }
 0x11d   :  { %v164_v37 = vadd.f32 %v162_v36, %v160_v35 }
 0x11f   :  { %v167_v39 = vadd.f32 %v165_v38, %v164_v37 }
 0x121   :  { %378 = vrsqrt.f32 %v167_v39 }
 0x12b   :  { %v379_v40 = vpop.eup %378 }
 0x12c   :  { %v169_v41 = vmul.f32 %v379_v40, %v156_v32  ;;  %v171_v42 = vrot.slane %v379_v40, 7  ;;  %v174_v43 = vrot.slane %v379_v40, 6  ;;  %v177_v47 = vmul.f32 %v379_v40, %v379_v40 }
 0x12e   :  { %v173_v44 = vmul.f32 %v171_v42, %v156_v32  ;;  %v176_v45 = vmul.f32 %v174_v43, %v156_v32  ;;  %v178_v46 = vmul.f32 %v169_v41, %v169_v41  ;;  %v181_v48 = vmul.f32 %v379_v40, %v169_v41 }
 0x130   :  { %v179_v49 = vmul.f32 %v173_v44, %v173_v44  ;;  %v180_v50 = vmul.f32 %v176_v45, %v176_v45  ;;  %v183_v51 = vrot.slane %v173_v44, 1  ;;  %v187_v52 = vrot.slane %v176_v45, 2 }
 0x131   :  { %v192_v53 = vrot.slane %v176_v45, 1  ;;  %v195_v54 = vadd.f32 %v178_v46, %v177_v47  ;;  %v210_v61 = vsub.f32 %v177_v47, %v178_v46  ;;  %v214_v62 = vrot.slane %v181_v48, 7 }
 0x132   :  { %v185_v55 = vmul.f32 %v379_v40, %v183_v51  ;;  %v189_v56 = vmul.f32 %v379_v40, %v187_v52  ;;  %v190_v57 = vmul.f32 %v183_v51, %v169_v41  ;;  %v191_v58 = vmul.f32 %v187_v52, %v169_v41 }
 0x133   :  { %v194_v59 = vmul.f32 %v192_v53, %v173_v44  ;;  %v197_v60 = vrot.slane %v179_v49, 1  ;;  %v201_v63 = vrot.slane %v180_v50, 2 }
 0x134   :  { %v204_v0 = vsub.f32 %v190_v57, %v189_v56  ;;  %v206_v1 = vadd.f32 %v191_v58, %v185_v55  ;;  %v208_v2 = vadd.f32 %v190_v57, %v189_v56  ;;  %v218_v6 = vsub.f32 %v191_v58, %v185_v55 }
 0x135   :  { %v199_v3 = vsub.f32 %v195_v54, %v197_v60  ;;  %v211_v4 = vadd.f32 %v210_v61, %v197_v60  ;;  %v216_v5 = vsub.f32 %v194_v59, %v214_v62  ;;  %v220_v10 = vadd.f32 %v214_v62, %v194_v59 }
 0x136   :  { %v205_v7 = vmul.f32 2.0, %v204_v0  ;;  %v207_v8 = vmul.f32 2.0, %v206_v1  ;;  %v209_v9 = vmul.f32 2.0, %v208_v2  ;;  %v222_v14 = vsub.f32 %v210_v61, %v197_v60 }
 0x137   :  { %v203_v11 = vsub.f32 %v199_v3, %v201_v63  ;;  %v212_v12 = vsub.f32 %v211_v4, %v201_v63  ;;  %v217_v13 = vmul.f32 2.0, %v216_v5  ;;  %v219_v17 = vmul.f32 2.0, %v218_v6 }
 0x138   :  { %v225_v15 = vrot.slane %v205_v7, 7  ;;  %v228_v16 = vrot.slane %v207_v8, 6  ;;  %v221_v19 = vmul.f32 2.0, %v220_v10  ;;  %v223_v20 = vadd.f32 %v222_v14, %v201_v63 }
 0x139   :  { %v231_v21 = vrot.slane %v209_v9, 5  ;;  %v234_v23 = vrot.slane %v212_v12, 4  ;;  %v237_v25 = vrot.slane %v217_v13, 4  ;;  %v240_v28 = vrot.slane %v219_v17, 2 }
 0x13a   :  { %v249_v22 = vsel %vm248_vm3, %v203_v11, %v225_v15  ;;  %v262_v27 = vsel %vm248_vm3, %v223_v20, %v246_v18  ;;  %v243_v31 = vrot.slane %v221_v19, 2 }
 0x13b   :  { %v251_v24 = vsel %vm250_vm4, %v249_v22, %v228_v16  ;;  %v263_v30 = vsel %vm250_vm4, %v262_v27, %v246_v18 }
 0x13c   :  { %v253_v26 = vsel %vm252_vm5, %v251_v24, %v231_v21  ;;  %v264_v33 = vsel %vm252_vm5, %v263_v30, %v246_v18 }
 0x13d   :  { %v255_v29 = vsel %vm254_vm6, %v253_v26, %v234_v23  ;;  %v265_v35 = vsel %vm254_vm6, %v264_v33, 0.0 }
 0x13e   :  { %v257_v32 = vsel %vm256_vm7, %v255_v29, %v237_v25  ;;  %267 = vst [vmem:[%s496_s3 + $0x8] sm:$0xff] %v265_v35 }
 0x13f   :  { %v259_v34 = vsel %vm258_vm8, %v257_v32, %v240_v28 }
 0x140   :  { %v261_v36 = vsel %vm260_vm9, %v259_v34, %v243_v31 }
 0x141   :  { %266 = vst [vmem:[%s496_s3] sm:$0xff] %v261_v36 }

</bundles_post_ra>
